<compile_context>
chip_gen: v7x
topology: tpu7x:2x2x1
jax: 0.10.0
libtpu: 0.0.40
codegen_flags: <defaults>
</compile_context>

<pallas_src>
import functools
from typing import NamedTuple

import jax
import jax.numpy as jnp
from jax.experimental import pallas as pl
from jax.experimental.pallas import tpu as pltpu

_MIB = 1024 * 1024


def _cdiv(a, b):
    return (a + b - 1) // b


def _round_up(x, m):
    return _cdiv(x, m) * m


def _pad2d(a, rows, cols):
    pr, pc = rows - a.shape[0], cols - a.shape[1]
    if pr == 0 and pc == 0:
        return a
    return jnp.pad(a, ((0, pr), (0, pc)))


class PreparedParams(NamedTuple):
    """Lane-padded, compute-dtype weights (padding/cast hoisted out of the per-call path)."""
    w1: jax.Array   # (F_p, H2_p)  compute dtype
    b1: jax.Array   # (1, H2_p)    f32
    w2: jax.Array   # (H2_p, H_p)  compute dtype
    b2: jax.Array   # (1, H_p)     f32
    w3: jax.Array   # (H_p, A_p)   compute dtype
    b3: jax.Array   # (1, A_p)     f32
    f_in: int
    num_actions: int


def prepare_params(params, compute_dtype=jnp.bfloat16):
    """Pad all feature dims to multiples of 128 and cast weights to the MXU dtype.
    Zero padding is exact for linear+relu; padded action lanes are handled in-kernel."""
    w1, b1, w2, b2, w3, b3 = params
    F_in, H2 = w1.shape
    H = w2.shape[1]
    A = w3.shape[1]
    F_p, H2_p, H_p, A_p = (_round_up(d, 128) for d in (F_in, H2, H, A))
    return PreparedParams(
        w1=_pad2d(w1, F_p, H2_p).astype(compute_dtype),
        b1=_pad2d(b1.reshape(1, -1), 1, H2_p).astype(jnp.float32),
        w2=_pad2d(w2, H2_p, H_p).astype(compute_dtype),
        b2=_pad2d(b2.reshape(1, -1), 1, H_p).astype(jnp.float32),
        w3=_pad2d(w3, H_p, A_p).astype(compute_dtype),
        b3=_pad2d(b3.reshape(1, -1), 1, A_p).astype(jnp.float32),
        f_in=int(F_in),
        num_actions=int(A),
    )


def _qnet_kernel(x_ref, w1_ref, b1_ref, w2_ref, b2_ref, w3_ref, b3_ref, o_ref,
                 acc_ref, *, use_softmax, inv_temperature, num_actions):
    k = pl.program_id(1)

    @pl.when(k == 0)
    def _():
        acc_ref[...] = jnp.zeros_like(acc_ref)

    # fc1 partial-K product. x arrives from HBM as f32; the cast to the MXU
    # compute dtype is a VPU op that co-issues with the matmul pipeline, so it
    # costs no extra HBM pass (vs. the old XLA-side pad+cast).
    acc_ref[...] += jnp.dot(x_ref[...].astype(w1_ref.dtype), w1_ref[...],
                            preferred_element_type=jnp.float32)

    @pl.when(k == pl.num_programs(1) - 1)
    def _():
        # fc1 bias + relu, then fc2 + relu, then fc3 — all on the resident tiles.
        h1 = jnp.maximum(acc_ref[...] + b1_ref[...], 0.0)
        h2 = jnp.dot(h1.astype(w2_ref.dtype), w2_ref[...],
                     preferred_element_type=jnp.float32)
        h2 = jnp.maximum(h2 + b2_ref[...], 0.0)
        logits = jnp.dot(h2.astype(w3_ref.dtype), w3_ref[...],
                         preferred_element_type=jnp.float32) + b3_ref[...]
        if use_softmax:
            # Padded action lanes must not contribute to the normalization.
            col = jax.lax.broadcasted_iota(jnp.int32, logits.shape, 1)
            z = jnp.where(col < num_actions, logits * inv_temperature, -jnp.inf)
            z = z - jnp.max(z, axis=-1, keepdims=True)
            e = jnp.exp(z)
            denom = jnp.sum(e, axis=-1, keepdims=True)
            # exact reciprocal so each row sums to 1 (downstream action sampling)
            o_ref[...] = (e * pl.reciprocal(denom, approx=False)).astype(o_ref.dtype)
        else:
            o_ref[...] = logits.astype(o_ref.dtype)


def _vmem_budget_bytes():
    """Chip-aware working VMEM budget, leaving headroom for compiler scratch."""
    cap = 64 * _MIB  # conservative default (v7x per-TC VMEM)
    try:
        info = pltpu.get_tpu_info()
        cap = int(getattr(info, "vmem_capacity_bytes", cap) or cap)
    except Exception:
        pass
    # v7x (64 MiB/TC) -> ~56 MiB; v5e/v6e (128 MiB) -> ~96 MiB
    return int(min(cap - 8 * _MIB, 96 * _MIB))


def qnetwork_forward(x, params, *, use_softmax=False, temperature=1.0,
                     compute_dtype=jnp.bfloat16, out_dtype=jnp.bfloat16,
                     batch_tile=512, return_padded=False):
    """x: (B, C*frame_history, H, W) float32. Returns (B, action_size) in
    `out_dtype` (or the lane-padded (B, A_p) slab when return_padded=True,
    which skips the final lane-slice copy; padded lanes are exact zeros)."""
    if not isinstance(params, PreparedParams):
        params = prepare_params(params, compute_dtype)
    p = params

    B = x.shape[0]
    x_flat = x.reshape(B, -1)                  # matches torch x.view(batch_size, -1)
    F_in = x_flat.shape[1]
    assert F_in == p.f_in, f"flattened input size {F_in} != prepared {p.f_in}"

    F_p, H2_p = p.w1.shape
    H_p = p.w2.shape[1]
    A_p = p.w3.shape[1]
    A = p.num_actions

    # Only pad the feature axis when it is not already lane-aligned (one copy);
    # the common configs (e.g. 4*16*16 = 1024) need no pad and no cast here.
    x_proc = x_flat if F_in == F_p else _pad2d(x_flat, B, F_p)

    cdt_b = jnp.dtype(compute_dtype).itemsize
    out_b = jnp.dtype(out_dtype).itemsize

    # --- tile selection -----------------------------------------------------
    if B <= 8:
        TB = B  # one block covering the whole batch dim (block == full dim is legal)
    else:
        # Guarantee >=2 batch tiles for moderate batches so the "parallel" axis
        # can shard across both v7x TensorCores (no effect on 1-TC v5e/v6e).
        TB = max(8, min(batch_tile, _round_up(_cdiv(B, 2), 8)))

    budget = _vmem_budget_bytes()

    def _vmem_need(tb, tk):
        # NOTE: weights/biases have constant index maps; Pallas may still double-
        # buffer them, so count 2x. (pipeline_mode=pl.Buffered(1) would halve this.)
        return (2 * tb * tk * 4                          # x block (f32, 2 bufs)
                + 2 * tk * H2_p * cdt_b                  # w1 block (2 bufs)
                + 2 * (H2_p * H_p + H_p * A_p) * cdt_b   # w2, w3
                + 2 * (H2_p + H_p + A_p) * 4             # biases
                + 2 * tb * A_p * out_b                   # output block
                + tb * H2_p * 4                          # fc1 accumulator scratch
                + tb * (H2_p + H_p + 2 * A_p) * 4)       # live intermediates

    # Stream w1 over K if it does not fit the budget (required on v7x for large F_in).
    TK = F_p
    while TK > 128 and _vmem_need(TB, TK) > budget:
        nxt = TK // 2
        if nxt % 128 != 0 or F_p % nxt != 0:
            break
        TK = nxt
    # Then shrink the batch tile if still over budget.
    while TB > 8 and _vmem_need(TB, TK) > budget:
        TB = max(8, _round_up(TB // 2, 8))

    num_b = _cdiv(B, TB)   # partial last tile: its garbage rows only land in
    num_k = F_p // TK      # output rows that are masked on store (and never returned)

    kernel = functools.partial(
        _qnet_kernel,
        use_softmax=bool(use_softmax),
        inv_temperature=float(1.0 / temperature),
        num_actions=A)

    flops = 2 * B * (F_p * H2_p + H2_p * H_p + H_p * A_p)
    bytes_accessed = (B * F_p * 4
                      + (F_p * H2_p + H2_p * H_p + H_p * A_p) * cdt_b
                      + (H2_p + H_p + A_p) * 4
                      + B * A_p * out_b)
    cost = pl.CostEstimate(flops=int(flops),
                           transcendentals=int(B * A_p if use_softmax else 0),
                           bytes_accessed=int(bytes_accessed))

    const = lambda r, c: pl.BlockSpec((r, c), lambda i, k: (0, 0))  # VMEM-resident

    out_p = pl.pallas_call(
        kernel,
        out_shape=jax.ShapeDtypeStruct((B, A_p), out_dtype),
        grid_spec=pltpu.PrefetchScalarGridSpec(
            num_scalar_prefetch=0,
            grid=(num_b, num_k),
            in_specs=[
                pl.BlockSpec((TB, TK), lambda i, k: (i, k)),     # x: (batch, K) tiles, f32
                pl.BlockSpec((TK, H2_p), lambda i, k: (k, 0)),   # w1: streamed over K
                const(1, H2_p),                                  # b1
                const(H2_p, H_p), const(1, H_p),                 # fc2 weight/bias
                const(H_p, A_p), const(1, A_p),                  # fc3 weight/bias
            ],
            out_specs=pl.BlockSpec((TB, A_p), lambda i, k: (i, 0)),
            scratch_shapes=[pltpu.VMEM((TB, H2_p), jnp.float32)],  # fc1 accumulator
        ),
        compiler_params=pltpu.CompilerParams(
            dimension_semantics=("parallel", "arbitrary"),
            vmem_limit_bytes=int(budget)),
        cost_estimate=cost,
    )(x_proc, p.w1, p.b1, p.w2, p.b2, p.w3, p.b3)

    if return_padded:
        return out_p                     # (B, A_p); extra lanes are exact zeros
    return out_p[:, :A]                  # module semantics: (B, action_size)


def init_params(key, flattened_size, hidden_size, action_size):
    """Kaiming-normal (fan_in, relu) like the PyTorch module; biases zero.
    Weights are stored transposed, i.e. (in_features, out_features)."""
    k1, k2, k3 = jax.random.split(key, 3)

    def kaiming(k, fan_in, fan_out):
        std = jnp.sqrt(2.0 / fan_in)
        return jax.random.normal(k, (fan_in, fan_out), jnp.float32) * std

    w1 = kaiming(k1, flattened_size, hidden_size * 2)
    b1 = jnp.zeros((1, hidden_size * 2), jnp.float32)
    w2 = kaiming(k2, hidden_size * 2, hidden_size)
    b2 = jnp.zeros((1, hidden_size), jnp.float32)
    w3 = kaiming(k3, hidden_size, action_size)
    b3 = jnp.zeros((1, action_size), jnp.float32)
    return (w1, b1, w2, b2, w3, b3)


def _reference(x, params, *, use_softmax=False, temperature=1.0,
               compute_dtype=jnp.bfloat16):
    """Pure-JAX reference using the same bf16-rounded operands as the kernel."""
    w1, b1, w2, b2, w3, b3 = params
    q = lambda a: a.astype(compute_dtype).astype(jnp.float32)
    hp = jax.lax.Precision.HIGHEST
    h = x.reshape(x.shape[0], -1)
    h = jnp.maximum(jnp.dot(q(h), q(w1), precision=hp) + b1, 0.0)
    h = jnp.maximum(jnp.dot(q(h), q(w2), precision=hp) + b2, 0.0)
    logits = jnp.dot(q(h), q(w3), precision=hp) + b3
    if use_softmax:
        return jax.nn.softmax(logits / temperature, axis=1)
    return logits


if __name__ == "__main__":
    # Small config: input_size = (channels=1, height=16, width=16), frame_history=4,
    # hidden_size=32, action_size=4  ->  flattened_size_no_conv = 4*16*16 = 1024.
    channels, height, width = 1, 16, 16
    frame_history = 4
    hidden_size = 32
    action_size = 4
    batch = 2
    actual_channels = channels * frame_history
    flattened = actual_channels * height * width

    key = jax.random.PRNGKey(0)
    kx, kp = jax.random.split(key)
    x = jax.random.normal(kx, (batch, actual_channels, height, width), jnp.float32)
    params = init_params(kp, flattened, hidden_size, action_size)
    prepared = prepare_params(params)          # pad + bf16-cast weights once

    # use_softmax=False branch (default of the module)
    out = jax.block_until_ready(qnetwork_forward(x, prepared, use_softmax=False))
    ref = _reference(x, params, use_softmax=False)
    assert out.shape == (batch, action_size)
    assert jnp.allclose(out.astype(jnp.float32), ref, atol=2e-2, rtol=2e-2)

    # softmax branch
    out_sm = jax.block_until_ready(
        qnetwork_forward(x, prepared, use_softmax=True, temperature=1.0))
    ref_sm = _reference(x, params, use_softmax=True, temperature=1.0)
    assert out_sm.shape == (batch, action_size)
    assert jnp.allclose(out_sm.astype(jnp.float32), ref_sm, atol=2e-2, rtol=2e-2)

    print("KERNEL_OK")
</pallas_src>

<mosaic_0001>
module attributes {stable_mosaic.version = 11 : i64} {
  func.func @_qnet_kernel(%arg0: i32, %arg1: i32, %arg2: memref<2x1024xf32, #tpu.memory_space<vmem>>, %arg3: memref<1024x128xbf16, #tpu.memory_space<vmem>>, %arg4: memref<1x128xf32, #tpu.memory_space<vmem>>, %arg5: memref<128x128xbf16, #tpu.memory_space<vmem>>, %arg6: memref<1x128xf32, #tpu.memory_space<vmem>>, %arg7: memref<128x128xbf16, #tpu.memory_space<vmem>>, %arg8: memref<1x128xf32, #tpu.memory_space<vmem>>, %arg9: memref<2x128xbf16, #tpu.memory_space<vmem>>, %arg10: memref<2x128xf32, #tpu.memory_space<vmem>>) attributes {dimension_semantics = [#tpu.dimension_semantics<parallel>, #tpu.dimension_semantics<arbitrary>], iteration_bounds = array<i64: 1, 1>, scalar_prefetch = 0 : i64, scratch_operands = 1 : i64, tpu.core_type = #tpu.core_type<tc>, window_params = [{transform_indices = @transform_0, window_bounds = array<i64: 2, 1024>}, {transform_indices = @transform_1, window_bounds = array<i64: 1024, 128>}, {pipeline_mode = #tpu.pipeline_mode<synchronous>, transform_indices = @transform_2, window_bounds = array<i64: 1, 128>}, {pipeline_mode = #tpu.pipeline_mode<synchronous>, transform_indices = @transform_3, window_bounds = array<i64: 128, 128>}, {pipeline_mode = #tpu.pipeline_mode<synchronous>, transform_indices = @transform_4, window_bounds = array<i64: 1, 128>}, {pipeline_mode = #tpu.pipeline_mode<synchronous>, transform_indices = @transform_5, window_bounds = array<i64: 128, 128>}, {pipeline_mode = #tpu.pipeline_mode<synchronous>, transform_indices = @transform_6, window_bounds = array<i64: 1, 128>}, {transform_indices = @transform_7, window_bounds = array<i64: 2, 128>}]} {
    %c0_i32 = arith.constant 0 : i32
    %0 = arith.cmpi eq, %arg1, %c0_i32 : i32
    %1 = arith.extui %0 : i1 to i32
    %c0_i32_0 = arith.constant 0 : i32
    %2 = arith.cmpi ne, %1, %c0_i32_0 : i32
    scf.if %2 {
      %cst_10 = arith.constant 0.000000e+00 : f32
      %13 = vector.broadcast %cst_10 : f32 to vector<2x128xf32>
      %c0_11 = arith.constant 0 : index
      %c0_12 = arith.constant 0 : index
      %14 = vector.load %arg10[%c0_11, %c0_12] : memref<2x128xf32, #tpu.memory_space<vmem>>, vector<2x128xf32>
      tpu.vector_store %arg10[%c0_11, %c0_12], %13 {strides = array<i32>} : memref<2x128xf32, #tpu.memory_space<vmem>>, vector<2x128xf32>,
    } else {
    }
    %c0 = arith.constant 0 : index
    %c0_1 = arith.constant 0 : index
    %3 = vector.load %arg10[%c0, %c0_1] : memref<2x128xf32, #tpu.memory_space<vmem>>, vector<2x128xf32>
    %c0_2 = arith.constant 0 : index
    %c0_3 = arith.constant 0 : index
    %4 = vector.load %arg2[%c0_2, %c0_3] : memref<2x1024xf32, #tpu.memory_space<vmem>>, vector<2x1024xf32>
    %5 = arith.truncf %4 : vector<2x1024xf32> to vector<2x1024xbf16>
    %c0_4 = arith.constant 0 : index
    %c0_5 = arith.constant 0 : index
    %6 = vector.load %arg3[%c0_4, %c0_5] : memref<1024x128xbf16, #tpu.memory_space<vmem>>, vector<1024x128xbf16>
    %cst = arith.constant dense<0.000000e+00> : vector<2x128xf32>
    %7 = tpu.matmul %5, %6, %cst {dimension_numbers = #tpu.dot_dimension_numbers<[1], [0], [0], [1], [0, 0, 1, 1], [], []>} : vector<2x1024xbf16>, vector<1024x128xbf16>, vector<2x128xf32> -> vector<2x128xf32>
    %8 = arith.addf %3, %7 : vector<2x128xf32>
    %c0_6 = arith.constant 0 : index
    %c0_7 = arith.constant 0 : index
    %9 = vector.load %arg10[%c0_6, %c0_7] : memref<2x128xf32, #tpu.memory_space<vmem>>, vector<2x128xf32>
    tpu.vector_store %arg10[%c0_6, %c0_7], %8 {strides = array<i32>} : memref<2x128xf32, #tpu.memory_space<vmem>>, vector<2x128xf32>,
    %c0_i32_8 = arith.constant 0 : i32
    %10 = arith.cmpi eq, %arg1, %c0_i32_8 : i32
    %11 = arith.extui %10 : i1 to i32
    %c0_i32_9 = arith.constant 0 : i32
    %12 = arith.cmpi ne, %11, %c0_i32_9 : i32
    scf.if %12 {
      %c0_10 = arith.constant 0 : index
      %c0_11 = arith.constant 0 : index
      %13 = vector.load %arg10[%c0_10, %c0_11] : memref<2x128xf32, #tpu.memory_space<vmem>>, vector<2x128xf32>
      %c0_12 = arith.constant 0 : index
      %c0_13 = arith.constant 0 : index
      %14 = vector.load %arg4[%c0_12, %c0_13] : memref<1x128xf32, #tpu.memory_space<vmem>>, vector<1x128xf32>
      %15 = vector.broadcast %14 : vector<1x128xf32> to vector<2x128xf32>
      %16 = arith.addf %13, %15 : vector<2x128xf32>
      %cst_14 = arith.constant 0.000000e+00 : f32
      %17 = vector.broadcast %cst_14 : f32 to vector<2x128xf32>
      %18 = arith.maximumf %16, %17 : vector<2x128xf32>
      %19 = arith.truncf %18 : vector<2x128xf32> to vector<2x128xbf16>
      %c0_15 = arith.constant 0 : index
      %c0_16 = arith.constant 0 : index
      %20 = vector.load %arg5[%c0_15, %c0_16] : memref<128x128xbf16, #tpu.memory_space<vmem>>, vector<128x128xbf16>
      %cst_17 = arith.constant dense<0.000000e+00> : vector<2x128xf32>
      %21 = tpu.matmul %19, %20, %cst_17 {dimension_numbers = #tpu.dot_dimension_numbers<[1], [0], [0], [1], [0, 0, 1, 1], [], []>} : vector<2x128xbf16>, vector<128x128xbf16>, vector<2x128xf32> -> vector<2x128xf32>
      %c0_18 = arith.constant 0 : index
      %c0_19 = arith.constant 0 : index
      %22 = vector.load %arg6[%c0_18, %c0_19] : memref<1x128xf32, #tpu.memory_space<vmem>>, vector<1x128xf32>
      %23 = vector.broadcast %22 : vector<1x128xf32> to vector<2x128xf32>
      %24 = arith.addf %21, %23 : vector<2x128xf32>
      %cst_20 = arith.constant 0.000000e+00 : f32
      %25 = vector.broadcast %cst_20 : f32 to vector<2x128xf32>
      %26 = arith.maximumf %24, %25 : vector<2x128xf32>
      %27 = arith.truncf %26 : vector<2x128xf32> to vector<2x128xbf16>
      %c0_21 = arith.constant 0 : index
      %c0_22 = arith.constant 0 : index
      %28 = vector.load %arg7[%c0_21, %c0_22] : memref<128x128xbf16, #tpu.memory_space<vmem>>, vector<128x128xbf16>
      %cst_23 = arith.constant dense<0.000000e+00> : vector<2x128xf32>
      %29 = tpu.matmul %27, %28, %cst_23 {dimension_numbers = #tpu.dot_dimension_numbers<[1], [0], [0], [1], [0, 0, 1, 1], [], []>} : vector<2x128xbf16>, vector<128x128xbf16>, vector<2x128xf32> -> vector<2x128xf32>
      %c0_24 = arith.constant 0 : index
      %c0_25 = arith.constant 0 : index
      %30 = vector.load %arg8[%c0_24, %c0_25] : memref<1x128xf32, #tpu.memory_space<vmem>>, vector<1x128xf32>
      %31 = vector.broadcast %30 : vector<1x128xf32> to vector<2x128xf32>
      %32 = arith.addf %29, %31 : vector<2x128xf32>
      %33 = arith.truncf %32 : vector<2x128xf32> to vector<2x128xbf16>
      %c0_26 = arith.constant 0 : index
      %c0_27 = arith.constant 0 : index
      %34 = vector.load %arg9[%c0_26, %c0_27] : memref<2x128xbf16, #tpu.memory_space<vmem>>, vector<2x128xbf16>
      tpu.vector_store %arg9[%c0_26, %c0_27], %33 {strides = array<i32>} : memref<2x128xbf16, #tpu.memory_space<vmem>>, vector<2x128xbf16>,
    } else {
    }
    return
  }
  func.func @transform_0(%arg0: i32, %arg1: i32) -> (i32, i32) {
    %c0_i32 = arith.constant 0 : i32
    return %arg0, %arg1 : i32, i32
  }
  func.func @transform_1(%arg0: i32, %arg1: i32) -> (i32, i32) {
    %c0_i32 = arith.constant 0 : i32
    %c0_i32_0 = arith.constant 0 : i32
    return %arg1, %c0_i32 : i32, i32
  }
  func.func @transform_2(%arg0: i32, %arg1: i32) -> (i32, i32) {
    %c0_i32 = arith.constant 0 : i32
    %c0_i32_0 = arith.constant 0 : i32
    %c0_i32_1 = arith.constant 0 : i32
    return %c0_i32, %c0_i32_0 : i32, i32
  }
  func.func @transform_3(%arg0: i32, %arg1: i32) -> (i32, i32) {
    %c0_i32 = arith.constant 0 : i32
    %c0_i32_0 = arith.constant 0 : i32
    %c0_i32_1 = arith.constant 0 : i32
    return %c0_i32, %c0_i32_0 : i32, i32
  }
  func.func @transform_4(%arg0: i32, %arg1: i32) -> (i32, i32) {
    %c0_i32 = arith.constant 0 : i32
    %c0_i32_0 = arith.constant 0 : i32
    %c0_i32_1 = arith.constant 0 : i32
    return %c0_i32, %c0_i32_0 : i32, i32
  }
  func.func @transform_5(%arg0: i32, %arg1: i32) -> (i32, i32) {
    %c0_i32 = arith.constant 0 : i32
    %c0_i32_0 = arith.constant 0 : i32
    %c0_i32_1 = arith.constant 0 : i32
    return %c0_i32, %c0_i32_0 : i32, i32
  }
  func.func @transform_6(%arg0: i32, %arg1: i32) -> (i32, i32) {
    %c0_i32 = arith.constant 0 : i32
    %c0_i32_0 = arith.constant 0 : i32
    %c0_i32_1 = arith.constant 0 : i32
    return %c0_i32, %c0_i32_0 : i32, i32
  }
  func.func @transform_7(%arg0: i32, %arg1: i32) -> (i32, i32) {
    %c0_i32 = arith.constant 0 : i32
    %c0_i32_0 = arith.constant 0 : i32
    return %arg0, %c0_i32 : i32, i32
  }
}

</mosaic_0001>

<bundles_post_ra>
// kernel: tpu_custom_call.1
= control target key start
LH: loop header
LB: loop body
LE: loop exit
PB: predicated region body
PF: predicated region fallthrough
CT: control target
= control target key end

     0   :  { %12 = vsyncpa [#allocation4], 0  ;;  %s1664_s0 = inlined_call_operand.hbm [shape: f32[2,1024], index: 0, kind: input, shape index: {}]   ;;  %s1665_s1 = inlined_call_operand.hbm [shape: bf16[1024,128], index: 1, kind: input, shape index: {}]   ;;  %s1666_s2 = inlined_call_operand.vmem [shape: f32[1,128], index: 2, kind: input, shape index: {}]   ;;  %s1667_s3 = inlined_call_operand.hbm [shape: bf16[128,128], index: 3, kind: input, shape index: {}]   ;;  %s1668_s4 = inlined_call_operand.vmem [shape: f32[1,128], index: 4, kind: input, shape index: {}]   ;;  %s1669_s5 = inlined_call_operand.hbm [shape: bf16[128,128], index: 5, kind: input, shape index: {}]   ;;  %s1670_s6 = inlined_call_operand.vmem [shape: f32[1,128], index: 6, kind: input, shape index: {}]   ;;  %s1671_s7 = inlined_call_operand.hbm [shape: bf16[2,128], index: 7, kind: output, shape index: {}]  }
   0x1   :  { %13 = vsyncpa [#allocation7], 0 }
   0x2   :  { %14 = vsyncpa [#allocation10], 0 }
   0x3   :  { %15 = vsyncpa [#allocation5], 0  ;;  %s1511_s24 = smov [#allocation6]   ;;  %s1393_s28 = scalar_lea.hbm %s1665_s1, 8192 }
   0x4   :  { %s31_s25 = sshll.u32 %s1511_s24, 4  ;;  %p1394_p0 = scmp.ne.s32.totalorder %s1665_s1, %s1393_s28  ;;  %s32_s25 = int_to_ptr.vmem [resolvable:$true] %s31_s25 }
   0x5   :  { %p1397_p1 = scmp.lt.u32.totalorder %s1393_s28, %s1665_s1 }
   0x7   :  { %p1399_p2 = pnand %p1397_p1, %p1394_p0 }
   0x9   :  { %1402 = shalt.err (!%p1399_p2)
}
   0xa   :  { %s1403_s10 = scalar_lea.vmem %s32_s25, 8192  ;;  %p1408_p4 = scmp.lt.s32.totalorder %s32_s25, %s32_s25 }
   0xb   :  { %p1404_p3 = scmp.ne.s32.totalorder %s32_s25, %s1403_s10  ;;  %p1409_p5 = scmp.lt.s32.totalorder %s1403_s10, %s1403_s10 }
   0xd   :  { %p1410_p6 = por %p1409_p5, %p1408_p4 }
   0xf   :  { %p1411_p7 = pnand %p1410_p6, %p1404_p3 }
  0x11   :  { %1414 = shalt.err (!%p1411_p7)
}
  0x12   :  { %s1512_s11 = smov 64   ;;  %s1513_s12 = smov 4  }
  0x13   :  { %37 = dma.hbm_to_vmem [thread:$0]  %s1665_s1, 8192, %s32_s25, [#allocation7], %s1512_s11, %s1512_s11, %s1513_s12  }
  0x14   :  { %s1514_s15 = smov [#allocation3]   ;;  %s1515_s17 = smov [#allocation8]  }
  0x15   :  { %s22_s16 = sshll.u32 %s1514_s15, 4  ;;  %s45_s18 = sshll.u32 %s1515_s17, 4  ;;  %s23_s16 = int_to_ptr.vmem [resolvable:$true] %s22_s16  ;;  %s46_s18 = int_to_ptr.vmem [resolvable:$true] %s45_s18 }
  0x16   :  { %s1415_s21 = scalar_lea.hbm %s1664_s0, 256 }
  0x17   :  { %p1416_p8 = scmp.ne.s32.totalorder %s1664_s0, %s1415_s21  ;;  %p1419_p9 = scmp.lt.u32.totalorder %s1415_s21, %s1664_s0 }
  0x19   :  { %p1421_p10 = pnand %p1419_p9, %p1416_p8 }
  0x1b   :  { %1424 = shalt.err (!%p1421_p10)
}
  0x1c   :  { %s1425_s1 = scalar_lea.vmem %s23_s16, 256  ;;  %p1430_p12 = scmp.lt.s32.totalorder %s23_s16, %s23_s16 }
  0x1d   :  { %p1426_p11 = scmp.ne.s32.totalorder %s23_s16, %s1425_s1  ;;  %p1431_p13 = scmp.lt.s32.totalorder %s1425_s1, %s1425_s1 }
  0x1f   :  { %p1432_p0 = por %p1431_p13, %p1430_p12 }
  0x21   :  { %p1433_p1 = pnand %p1432_p0, %p1426_p11 }
  0x23   :  { %1436 = shalt.err (!%p1433_p1)
}
  0x24   :  { %25 = dma.hbm_to_vmem [thread:$0]  %s1664_s0, 256, %s23_s16, [#allocation4]  }
  0x25   :  { %s1437_s30 = scalar_lea.hbm %s1667_s3, 1024 }
  0x26   :  { %p1438_p2 = scmp.ne.s32.totalorder %s1667_s3, %s1437_s30  ;;  %p1441_p3 = scmp.lt.u32.totalorder %s1437_s30, %s1667_s3 }
  0x28   :  { %p1443_p4 = pnand %p1441_p3, %p1438_p2 }
  0x2a   :  { %1446 = shalt.err (!%p1443_p4)
}
  0x2b   :  { %s1447_s14 = scalar_lea.vmem %s46_s18, 1024  ;;  %p1452_p6 = scmp.lt.s32.totalorder %s46_s18, %s46_s18 }
  0x2c   :  { %p1448_p5 = scmp.ne.s32.totalorder %s46_s18, %s1447_s14  ;;  %p1453_p7 = scmp.lt.s32.totalorder %s1447_s14, %s1447_s14 }
  0x2e   :  { %p1454_p8 = por %p1453_p7, %p1452_p6 }
  0x30   :  { %p1455_p9 = pnand %p1454_p8, %p1448_p5 }
  0x32   :  { %1458 = shalt.err (!%p1455_p9)
}
  0x33   :  { %51 = dma.hbm_to_vmem [thread:$0]  %s1667_s3, 1024, %s46_s18, [#allocation7], %s1512_s11, %s1512_s11, %s1513_s12  }
  0x34   :  { %s1516_s16 = smov [#allocation9]   ;;  %s1459_s21 = scalar_lea.hbm %s1669_s5, 1024 }
  0x35   :  { %s59_s17 = sshll.u32 %s1516_s16, 4  ;;  %p1460_p10 = scmp.ne.s32.totalorder %s1669_s5, %s1459_s21  ;;  %s60_s17 = int_to_ptr.vmem [resolvable:$true] %s59_s17 }
  0x36   :  { %p1463_p11 = scmp.lt.u32.totalorder %s1459_s21, %s1669_s5 }
  0x38   :  { %p1465_p12 = pnand %p1463_p11, %p1460_p10 }
  0x3a   :  { %1468 = shalt.err (!%p1465_p12)
}
  0x3b   :  { %s1469_s1 = scalar_lea.vmem %s60_s17, 1024  ;;  %p1474_p0 = scmp.lt.s32.totalorder %s60_s17, %s60_s17 }
  0x3c   :  { %p1470_p13 = scmp.ne.s32.totalorder %s60_s17, %s1469_s1  ;;  %p1475_p1 = scmp.lt.s32.totalorder %s1469_s1, %s1469_s1 }
  0x3e   :  { %p1476_p2 = por %p1475_p1, %p1474_p0 }
  0x40   :  { %p1477_p3 = pnand %p1476_p2, %p1470_p13 }
  0x42   :  { %1480 = shalt.err (!%p1477_p3)
}
  0x43   :  { %65 = dma.hbm_to_vmem [thread:$0]  %s1669_s5, 1024, %s60_s17, [#allocation10], %s1512_s11, %s1512_s11, %s1513_s12  }
  0x44   :  { %1503 = dma.done.wait [#allocation4], 256  }
  0x45   :  { %1504 = vsyncadd [#allocation4], 4294967040 }
  0x46   :  { %1505 = dma.done.wait [#allocation7], 9216  }
  0x47   :  { %1506 = vsyncadd [#allocation7], 4294958080 }
  0x48   :  { %1507 = dma.done.wait [#allocation10], 1024  }
  0x49   :  { %1508 = vsyncadd [#allocation10], 4294966272  ;;  %v1311_v0 = vld [vmem:[#allocation6 + $0x40] sm:$0xff]   ;;  %v1315_v4 = vld [vmem:[#allocation6 + $0x48] sm:$0xff]   ;;  %v1517_v22 = vmov 1983009808   ;;  %v95_v24 = vlaneseq }
  0x4a   :  { %v1312_v1 = vld [vmem:[#allocation6 + $0xc0] sm:$0xff]   ;;  %1155 = vmatprep.subr.bf16.mxu0 %v1311_v0  ;;  %v1316_v5 = vld [vmem:[#allocation6 + $0xc8] sm:$0xff]   ;;  %v1319_v8 = vld [vmem:[#allocation6 + $0x50] sm:$0xff]   ;;  %v93_v23 = vunpack.c.l.s4 %v1517_v22  ;;  %vm1519_vm0 = vmmov 0   ;;  %s1520_s28 = smov [#allocation11]  }
  0x4b   :  { %v1313_v2 = vld [vmem:[#allocation6] sm:$0xff]   ;;  %1177 = vmatprep.subr.bf16.mxu1 %v1312_v1  ;;  %v1317_v6 = vld [vmem:[#allocation6 + $0x8] sm:$0xff]   ;;  %v1320_v9 = vld [vmem:[#allocation6 + $0xd0] sm:$0xff]   ;;  %v96_v30 = vshrl.u32 %v95_v24, 7  ;;  %s1061_s29 = sshll.u32 %s1520_s28, 4  ;;  %s1062_s29 = int_to_ptr.vmem [resolvable:$true] %s1061_s29 }
  0x4c   :  { %v1314_v3 = vld [vmem:[#allocation6 + $0x80] sm:$0xff]   ;;  %1156 = vmatpush3.bf16.msra.mxu0 %v1313_v2  ;;  %v1318_v7 = vld [vmem:[#allocation6 + $0x88] sm:$0xff]   ;;  %v1321_v10 = vld [vmem:[#allocation6 + $0x10] sm:$0xff]   ;;  %v94_v29 = vunpack.c.0.s8 %v93_v23  ;;  %s1485_s30 = scalar_lea.vmem %s1062_s29, 32  ;;  %p1486_p5 = scmp.lt.s32.totalorder %s1062_s29, %s1062_s29 }
  0x4d   :  { %1178 = vmatpush3.bf16.msra.mxu1 %v1314_v3  ;;  %1157 = vmatprep.subr.bf16.mxu0 %v1315_v4  ;;  %v1322_v11 = vld [vmem:[#allocation6 + $0x90] sm:$0xff]   ;;  %v1323_v12 = vld [vmem:[#allocation6 + $0x58] sm:$0xff]   ;;  %v1327_v16 = vld [vmem:[#allocation6 + $0x60] sm:$0xff]  }
  0x4e   :  { %1179 = vmatprep.subr.bf16.mxu1 %v1316_v5  ;;  %v1324_v13 = vld [vmem:[#allocation6 + $0xd8] sm:$0xff]   ;;  %v1328_v17 = vld [vmem:[#allocation6 + $0xe0] sm:$0xff]   ;;  %v1331_v20 = vld [vmem:[#allocation6 + $0x68] sm:$0xff]   ;;  %v1618_v35 = vsub.s32 %v94_v29, %v96_v30 }
  0x4f   :  { %v1325_v14 = vld [vmem:[#allocation6 + $0x18] sm:$0xff]   ;;  %v1329_v18 = vld [vmem:[#allocation6 + $0x20] sm:$0xff]   ;;  %v1332_v21 = vld [vmem:[#allocation6 + $0xe8] sm:$0xff]  }
  0x50   :  { %1158 = vmatpush3.bf16.msra.mxu0 %v1317_v6  ;;  %v1326_v15 = vld [vmem:[#allocation6 + $0x98] sm:$0xff]   ;;  %v1330_v19 = vld [vmem:[#allocation6 + $0xa0] sm:$0xff]   ;;  %v1333_v25 = vld [vmem:[#allocation6 + $0x28] sm:$0xff]  }
  0x51   :  { %1180 = vmatpush3.bf16.msra.mxu1 %v1318_v7  ;;  %1159 = vmatprep.subr.bf16.mxu0 %v1319_v8  ;;  %v1334_v26 = vld [vmem:[#allocation6 + $0xa8] sm:$0xff]   ;;  %v1335_v27 = vld [vmem:[#allocation6 + $0x70] sm:$0xff]   ;;  %v1339_v33 = vld [vmem:[#allocation6 + $0x78] sm:$0xff]  }
  0x52   :  { %1181 = vmatprep.subr.bf16.mxu1 %v1320_v9  ;;  %v1336_v28 = vld [vmem:[#allocation6 + $0xf0] sm:$0xff]   ;;  %v1340_v34 = vld [vmem:[#allocation6 + $0xf8] sm:$0xff]   ;;  %v1344_v41 = vld [vmem:[#allocation6 + $0x140] sm:$0xff]  }
  0x53   :  { %v1337_v31 = vld [vmem:[#allocation6 + $0x30] sm:$0xff]   ;;  %v1341_v36 = vld [vmem:[#allocation6 + $0x38] sm:$0xff]   ;;  %v1345_v42 = vld [vmem:[#allocation6 + $0x1c0] sm:$0xff]  }
  0x54   :  { %1160 = vmatpush3.bf16.msra.mxu0 %v1321_v10  ;;  %v1338_v32 = vld [vmem:[#allocation6 + $0xb0] sm:$0xff]   ;;  %v1342_v37 = vld [vmem:[#allocation6 + $0xb8] sm:$0xff]   ;;  %v1346_v46 = vld [vmem:[#allocation6 + $0x100] sm:$0xff]  }
  0x55   :  { %1182 = vmatpush3.bf16.msra.mxu1 %v1322_v11  ;;  %1161 = vmatprep.subr.bf16.mxu0 %v1323_v12  ;;  %v87_v38 = vld [vmem:[#allocation3] sm:$0xff]  ;;  %v1347_v49 = vld [vmem:[#allocation6 + $0x180] sm:$0xff]   ;;  %v1348_v51 = vld [vmem:[#allocation6 + $0x148] sm:$0xff]  }
  0x56   :  { %1183 = vmatprep.subr.bf16.mxu1 %v1324_v13  ;;  %v98_v39 = vrot.slane %v87_v38, %v1618_v35  ;;  %v91_v40 = vcombine.high %v87_v38, %v87_v38  ;;  %v1349_v53 = vld [vmem:[#allocation6 + $0x1c8] sm:$0xff]   ;;  %v1352_v56 = vld [vmem:[#allocation6 + $0x150] sm:$0xff]   ;;  %v1356_v60 = vld [vmem:[#allocation6 + $0x158] sm:$0xff]  }
  0x57   :  { %v1350_v54 = vld [vmem:[#allocation6 + $0x108] sm:$0xff]   ;;  %v1353_v57 = vld [vmem:[#allocation6 + $0x1d0] sm:$0xff]   ;;  %v1357_v61 = vld [vmem:[#allocation6 + $0x1d8] sm:$0xff]  }
  0x58   :  { %1162 = vmatpush3.bf16.msra.mxu0 %v1325_v14  ;;  %v106_v43 = vcombine.high %v98_v39, %v98_v39  ;;  %v105_v44 = vrot.slane %v91_v40, %v1618_v35  ;;  %v133_v45 = vpack.c.bf16 %v98_v39, %v98_v39  ;;  %v1351_v55 = vld [vmem:[#allocation6 + $0x188] sm:$0xff]   ;;  %v1354_v58 = vld [vmem:[#allocation6 + $0x110] sm:$0xff]   ;;  %v1358_v62 = vld [vmem:[#allocation6 + $0x118] sm:$0xff]  }
  0x59   :  { %1184 = vmatpush3.bf16.msra.mxu1 %v1326_v15  ;;  %1163 = vmatprep.subr.bf16.mxu0 %v1327_v16  ;;  %v1355_v59 = vld [vmem:[#allocation6 + $0x190] sm:$0xff]   ;;  %v1359_v63 = vld [vmem:[#allocation6 + $0x198] sm:$0xff]   ;;  %v1360_v0 = vld [vmem:[#allocation6 + $0x160] sm:$0xff]  }
  0x5a   :  { %1185 = vmatprep.subr.bf16.mxu1 %v1328_v17  ;;  %v134_v47 = vpack.c.bf16 %v106_v43, %v106_v43  ;;  %v107_v48 = vcombine.high %v105_v44, %v105_v44  ;;  %v135_v50 = vpack.c.bf16 %v105_v44, %v105_v44  ;;  %v1361_v1 = vld [vmem:[#allocation6 + $0x1e0] sm:$0xff]   ;;  %v1364_v4 = vld [vmem:[#allocation6 + $0x168] sm:$0xff]   ;;  %v1368_v8 = vld [vmem:[#allocation6 + $0x170] sm:$0xff]  }
  0x5b   :  { %v1362_v2 = vld [vmem:[#allocation6 + $0x120] sm:$0xff]   ;;  %v1365_v5 = vld [vmem:[#allocation6 + $0x1e8] sm:$0xff]   ;;  %v1369_v9 = vld [vmem:[#allocation6 + $0x1f0] sm:$0xff]  }
  0x5c   :  { %1164 = vmatpush3.bf16.msra.mxu0 %v1329_v18  ;;  %685 = vmatprep.mubr.bf16.mxu0 %v134_v47  ;;  %v136_v52 = vpack.c.bf16 %v107_v48, %v107_v48  ;;  %v1363_v3 = vld [vmem:[#allocation6 + $0x1a0] sm:$0xff]   ;;  %v1366_v6 = vld [vmem:[#allocation6 + $0x128] sm:$0xff]   ;;  %v1370_v10 = vld [vmem:[#allocation6 + $0x130] sm:$0xff]  }
  0x5d   :  { %1186 = vmatpush3.bf16.msra.mxu1 %v1330_v19  ;;  %1165 = vmatprep.subr.bf16.mxu0 %v1331_v20  ;;  %v1367_v7 = vld [vmem:[#allocation6 + $0x1a8] sm:$0xff]   ;;  %v1371_v11 = vld [vmem:[#allocation6 + $0x1b0] sm:$0xff]   ;;  %v1372_v12 = vld [vmem:[#allocation6 + $0x178] sm:$0xff]  }
  0x5e   :  { %1187 = vmatprep.subr.bf16.mxu1 %v1332_v21  ;;  %725 = vmatprep.mubr.bf16.mxu1 %v136_v52  ;;  %v1373_v13 = vld [vmem:[#allocation6 + $0x1f8] sm:$0xff]   ;;  %v1379_v29 = vld [vmem:[#allocation8 + $0x10] sm:$0xff]   ;;  %v1389_v39 = vld [vmem:[#allocation9 + $0x20] sm:$0xff]  }
  0x5f   :  { %v1374_v14 = vld [vmem:[#allocation6 + $0x138] sm:$0xff]   ;;  %v1390_v40 = vld [vmem:[#allocation9 + $0x28] sm:$0xff]  }
  0x60   :  { %1166 = vmatpush3.bf16.msra.mxu0 %v1333_v25  ;;  %v88_v15 = vld [vmem:[#allocation3 + $0x8] sm:$0xff] }
  0x61   :  { %1188 = vmatpush3.bf16.msra.mxu1 %v1334_v26  ;;  %1167 = vmatprep.subr.bf16.mxu0 %v1335_v27  ;;  %v1375_v16 = vld [vmem:[#allocation6 + $0x1b8] sm:$0xff]   ;;  %v115_v17 = vrot.slane %v88_v15, %v1618_v35  ;;  %v108_v18 = vcombine.high %v88_v15, %v88_v15  ;;  %v1377_v26 = vld [vmem:[#allocation8] sm:$0xff]   ;;  %v1518_v27 = vmov 0.0  }
  0x62   :  { %1189 = vmatprep.subr.bf16.mxu1 %v1336_v28  ;;  %85 = vst [vmem:[#allocation2] sm:$0x3] %v1518_v27  ;;  %v1378_v28 = vld [vmem:[#allocation8 + $0x8] sm:$0xff]   ;;  %v1380_v30 = vld [vmem:[#allocation8 + $0x18] sm:$0xff]  }
  0x63   :  { %v123_v19 = vcombine.high %v115_v17, %v115_v17  ;;  %v122_v20 = vrot.slane %v108_v18, %v1618_v35  ;;  %v137_v21 = vpack.c.bf16 %v115_v17, %v115_v17  ;;  %v1385_v35 = vld [vmem:[#allocation9] sm:$0xff]   ;;  %v1388_v38 = vld [vmem:[#allocation9 + $0x18] sm:$0xff]   ;;  %v1146_v17 = vld [vmem:[%s1670_s6] ss:$0 sm:$0xff] }
  0x64   :  { %1168 = vmatpush3.bf16.msra.mxu0 %v1337_v31  ;;  %v1381_v31 = vld [vmem:[#allocation8 + $0x20] sm:$0xff]  }
  0x65   :  { %1190 = vmatpush3.bf16.msra.mxu1 %v1338_v32  ;;  %1169 = vmatprep.subr.bf16.mxu0 %v1339_v33  ;;  %v138_v22 = vpack.c.bf16 %v123_v19, %v123_v19  ;;  %v124_v23 = vcombine.high %v122_v20, %v122_v20  ;;  %v139_v24 = vpack.c.bf16 %v122_v20, %v122_v20  ;;  %v1382_v32 = vld [vmem:[#allocation8 + $0x28] sm:$0xff]   ;;  %v1383_v33 = vld [vmem:[#allocation8 + $0x30] sm:$0xff]  }
  0x66   :  { %1191 = vmatprep.subr.bf16.mxu1 %v1340_v34  ;;  %v1384_v34 = vld [vmem:[#allocation8 + $0x38] sm:$0xff]  }
  0x67   :  { %v140_v25 = vpack.c.bf16 %v124_v23, %v124_v23 }
  0x68   :  { %1170 = vmatpush3.bf16.msra.mxu0 %v1341_v36  ;;  %v1386_v36 = vld [vmem:[#allocation9 + $0x8] sm:$0xff]  }
  0x69   :  { %1192 = vmatpush3.bf16.msra.mxu1 %v1342_v37  ;;  %1199 = vmatprep.subr.bf16.mxu0 %v1344_v41  ;;  %v1387_v37 = vld [vmem:[#allocation9 + $0x10] sm:$0xff]  }
  0x6a   :  { %1221 = vmatprep.subr.bf16.mxu1 %v1345_v42 }
  0x6b   :  { %686 = vmatmul.mubr.bf16.vlgmr.msra.gmra.mrb[0].mxu0 %v133_v45 }
  0x6c   :  { %1200 = vmatpush3.bf16.msra.mxu0 %v1346_v46  ;;  %726 = vmatmul.mubr.bf16.vlgmr.msra.gmra.mrb[0].mxu1 %v135_v50 }
  0x6d   :  { %1201 = vmatprep.subr.bf16.mxu0 %v1348_v51  ;;  %1222 = vmatpush3.bf16.msra.mxu1 %v1347_v49 }
  0x6e   :  { %1223 = vmatprep.subr.bf16.mxu1 %v1349_v53  ;;  %765 = vmatprep.mubr.bf16.mxu0 %v138_v22 }
  0x6f   :  { %805 = vmatprep.mubr.bf16.mxu1 %v140_v25 }
  0x70   :  { %1202 = vmatpush3.bf16.msra.mxu0 %v1350_v54 }
  0x71   :  { %1203 = vmatprep.subr.bf16.mxu0 %v1352_v56  ;;  %1224 = vmatpush3.bf16.msra.mxu1 %v1351_v55 }
  0x72   :  { %1225 = vmatprep.subr.bf16.mxu1 %v1353_v57 }
  0x74   :  { %1204 = vmatpush3.bf16.msra.mxu0 %v1354_v58 }
  0x75   :  { %1205 = vmatprep.subr.bf16.mxu0 %v1356_v60  ;;  %1226 = vmatpush3.bf16.msra.mxu1 %v1355_v59 }
  0x76   :  { %1227 = vmatprep.subr.bf16.mxu1 %v1357_v61 }
  0x78   :  { %1206 = vmatpush3.bf16.msra.mxu0 %v1358_v62  ;;  %v86_v62 = vld [vmem:[#allocation2] sm:$0x3] }
  0x79   :  { %1207 = vmatprep.subr.bf16.mxu0 %v1360_v0  ;;  %1228 = vmatpush3.bf16.msra.mxu1 %v1359_v63 }
  0x7a   :  { %1229 = vmatprep.subr.bf16.mxu1 %v1361_v1 }
  0x7c   :  { %1208 = vmatpush3.bf16.msra.mxu0 %v1362_v2  ;;  %v1136_v2 = vld [vmem:[%s1666_s2] ss:$0 sm:$0xff] }
  0x7d   :  { %1209 = vmatprep.subr.bf16.mxu0 %v1364_v4  ;;  %1230 = vmatpush3.bf16.msra.mxu1 %v1363_v3 }
  0x7e   :  { %1231 = vmatprep.subr.bf16.mxu1 %v1365_v5 }
  0x80   :  { %1210 = vmatpush3.bf16.msra.mxu0 %v1366_v6 }
  0x81   :  { %1211 = vmatprep.subr.bf16.mxu0 %v1368_v8  ;;  %1232 = vmatpush3.bf16.msra.mxu1 %v1367_v7  ;;  %v1391_v7 = vld [vmem:[#allocation9 + $0x30] sm:$0xff]   ;;  %v1392_v8 = vld [vmem:[#allocation9 + $0x38] sm:$0xff]  }
  0x82   :  { %1233 = vmatprep.subr.bf16.mxu1 %v1369_v9  ;;  %v1137_v9 = vld [vmem:[%s1668_s4] ss:$0 sm:$0xff]  ;;  %s1481_s4 = scalar_lea.vmem %s1062_s29, 16 }
  0x83   :  { %p1482_p4 = scmp.ne.s32.totalorder %s1062_s29, %s1481_s4  ;;  %p1487_p6 = scmp.lt.s32.totalorder %s1485_s30, %s1481_s4 }
  0x84   :  { %1212 = vmatpush3.bf16.msra.mxu0 %v1370_v10 }
  0x85   :  { %1213 = vmatprep.subr.bf16.mxu0 %v1372_v12  ;;  %1234 = vmatpush3.bf16.msra.mxu1 %v1371_v11  ;;  %p1488_p7 = por %p1487_p6, %p1486_p5 }
  0x86   :  { %1235 = vmatprep.subr.bf16.mxu1 %v1373_v13 }
  0x87   :  { %p1489_p8 = pnand %p1488_p7, %p1482_p4 }
  0x88   :  { %1214 = vmatpush3.bf16.msra.mxu0 %v1374_v14 }
  0x89   :  { %1236 = vmatpush3.bf16.msra.mxu1 %v1375_v16  ;;  %1261 = vmatprep.subr.bf16.mxu0 %v1518_v27 }
  0x8a   :  { %1281 = vmatprep.subr.bf16.mxu1 %v1518_v27 }
  0x8b   :  { %766 = vmatmul.mubr.bf16.vlgmr.msra.gmra.mrb[4].mxu0 %v137_v21 }
  0x8c   :  { %806 = vmatmul.mubr.bf16.vlgmr.msra.gmra.mrb[4].mxu1 %v139_v24  ;;  %1262 = vmatpush3.bf16.msra.mxu0 %v1377_v26 }
  0x8d   :  { %1263 = vmatprep.subr.bf16.mxu0 %v1518_v27  ;;  %1277 = vmatprep.mubr.msk.bf16.mxu0 %vm1519_vm0, %v1518_v27 }
  0x8e   :  { %1297 = vmatprep.mubr.msk.bf16.mxu1 %vm1519_vm0, %v1518_v27  ;;  %1282 = vmatpush3.bf16.msra.mxu1 %v1385_v35 }
  0x8f   :  { %1283 = vmatprep.subr.bf16.mxu1 %v1518_v27 }
  0x90   :  { %1264 = vmatpush3.bf16.msra.mxu0 %v1378_v28 }
  0x91   :  { %1265 = vmatprep.subr.bf16.mxu0 %v1518_v27 }
  0x92   :  { %1284 = vmatpush3.bf16.msra.mxu1 %v1386_v36 }
  0x93   :  { %1285 = vmatprep.subr.bf16.mxu1 %v1518_v27 }
  0x94   :  { %1266 = vmatpush3.bf16.msra.mxu0 %v1379_v29 }
  0x95   :  { %1267 = vmatprep.subr.bf16.mxu0 %v1518_v27 }
  0x96   :  { %1286 = vmatpush3.bf16.msra.mxu1 %v1387_v37 }
  0x97   :  { %1287 = vmatprep.subr.bf16.mxu1 %v1518_v27 }
  0x98   :  { %1268 = vmatpush3.bf16.msra.mxu0 %v1380_v30 }
  0x99   :  { %1269 = vmatprep.subr.bf16.mxu0 %v1518_v27 }
  0x9a   :  { %1288 = vmatpush3.bf16.msra.mxu1 %v1388_v38 }
  0x9b   :  { %1289 = vmatprep.subr.bf16.mxu1 %v1518_v27 }
  0x9c   :  { %1270 = vmatpush3.bf16.msra.mxu0 %v1381_v31 }
  0x9d   :  { %1271 = vmatprep.subr.bf16.mxu0 %v1518_v27 }
  0x9e   :  { %1290 = vmatpush3.bf16.msra.mxu1 %v1389_v39 }
  0x9f   :  { %1291 = vmatprep.subr.bf16.mxu1 %v1518_v27 }
  0xa0   :  { %1272 = vmatpush3.bf16.msra.mxu0 %v1382_v32 }
  0xa1   :  { %1273 = vmatprep.subr.bf16.mxu0 %v1518_v27 }
  0xa2   :  { %1292 = vmatpush3.bf16.msra.mxu1 %v1390_v40 }
  0xa3   :  { %1293 = vmatprep.subr.bf16.mxu1 %v1518_v27 }
  0xa4   :  { %1274 = vmatpush3.bf16.msra.mxu0 %v1383_v33 }
  0xa5   :  { %1275 = vmatprep.subr.bf16.mxu0 %v1518_v27 }
  0xa6   :  { %1294 = vmatpush3.bf16.msra.mxu1 %v1391_v7 }
  0xa7   :  { %1295 = vmatprep.subr.bf16.mxu1 %v1518_v27 }
  0xa8   :  { %1276 = vmatpush3.bf16.msra.mxu0 %v1384_v34 }
  0xaa   :  { %1296 = vmatpush3.bf16.msra.mxu1 %v1392_v8 }
 0x13e   :  { %v1171_v41 = vpop.f32.mrb[0].mxu0 }
 0x13f   :  { %v1172_v42 = vpop.f32.mrb[1].mxu0  ;;  %v1193_v43 = vpop.f32.mrb[0].mxu1 }
 0x140   :  { %v1173_v44 = vadd.f32 %v1172_v42, %v1171_v41  ;;  %v1174_v45 = vpop.f32.mrb[2].mxu0  ;;  %v1194_v46 = vpop.f32.mrb[1].mxu1 }
 0x141   :  { %v1175_v47 = vpop.f32.mrb[3].mxu0  ;;  %v1195_v48 = vadd.f32 %v1194_v46, %v1193_v43  ;;  %v1196_v49 = vpop.f32.mrb[2].mxu1 }
 0x142   :  { %v1197_v50 = vpop.f32.mrb[3].mxu1 }
 0x143   :  { %v728_v51 = vadd.f32 %v1195_v48, %v1173_v44 }
 0x15e   :  { %v1215_v52 = vpop.f32.mrb[4].mxu0 }
 0x15f   :  { %v1216_v53 = vpop.f32.mrb[5].mxu0  ;;  %v1237_v54 = vpop.f32.mrb[4].mxu1 }
 0x160   :  { %v1217_v55 = vadd.f32 %v1216_v53, %v1215_v52  ;;  %v1218_v56 = vpop.f32.mrb[6].mxu0  ;;  %v1238_v57 = vpop.f32.mrb[5].mxu1 }
 0x161   :  { %v1219_v58 = vpop.f32.mrb[7].mxu0  ;;  %v1239_v60 = vadd.f32 %v1238_v57, %v1237_v54  ;;  %v1240_v61 = vpop.f32.mrb[6].mxu1 }
 0x162   :  { %v768_v59 = vadd.f32 %v1217_v55, %v728_v51  ;;  %v1241_v63 = vpop.f32.mrb[7].mxu1 }
 0x164   :  { %v808_v0 = vadd.f32 %v1239_v60, %v768_v59 }
 0x166   :  { %v813_v1 = vadd.f32 %v808_v0, %v86_v62 }
 0x168   :  { %814 = vst [vmem:[#allocation2] sm:$0x3] %v813_v1 }
 0x16f   :  { %v818_v3 = vld [vmem:[#allocation2] sm:$0x3] }
 0x170   :  { %v826_v4 = vadd.f32 %v1136_v2, %v818_v3 }
 0x172   :  { %v827_v5 = vmax.f32 %v826_v4, 0.0 }
 0x174   :  { %v828_v6 = vpack.c.bf16 %v827_v5, %v827_v5 }
 0x176   :  { %1278 = vmatmul.mubr.bf16.vlgmr.msra.gmra.mrb[8].mxu0 %v828_v6 }
 0x249   :  { %v934_v10 = vpop.f32.mrb[8].mxu0 }
 0x24a   :  { %v935_v11 = vadd.f32 %v1137_v9, %v934_v10  ;;  %v1279_v12 = vpop.f32.mrb[9].mxu0 }
 0x24b   :  { %v937_v13 = vpop.f32.mrb[10].mxu0 }
 0x24c   :  { %v940_v14 = vmax.f32 %v935_v11, 0.0  ;;  %v1280_v15 = vpop.f32.mrb[11].mxu0 }
 0x24e   :  { %v941_v16 = vpack.c.bf16 %v940_v14, %v940_v14 }
 0x250   :  { %1298 = vmatmul.mubr.bf16.vlgmr.msra.gmra.mrb[8].mxu1 %v941_v16 }
 0x323   :  { %v1047_v18 = vpop.f32.mrb[8].mxu1 }
 0x324   :  { %v1048_v19 = vadd.f32 %v1146_v17, %v1047_v18  ;;  %v1299_v20 = vpop.f32.mrb[9].mxu1 }
 0x325   :  { %v1050_v21 = vpop.f32.mrb[10].mxu1 }
 0x326   :  { %v1053_v22 = vpack.c.bf16 %v1048_v19, %v1048_v19  ;;  %v1300_v23 = vpop.f32.mrb[11].mxu1 }
 0x328   :  { %1054 = vst [vmem:[#allocation11] sm:$0x1] %v1053_v22 }
 0x329   :  { %1492 = shalt.err (!%p1489_p8)
}
 0x32a   :  { %s1493_s9 = scalar_lea.hbm %s1671_s7, 16 }
 0x32b   :  { %p1494_p9 = scmp.ne.s32.totalorder %s1671_s7, %s1493_s9  ;;  %p1497_p10 = scmp.lt.u32.totalorder %s1493_s9, %s1671_s7 }
 0x32d   :  { %p1499_p11 = pnand %p1497_p10, %p1494_p9 }
 0x32f   :  { %1502 = shalt.err (!%p1499_p11)
}
 0x330   :  { %1064 = dma.vmem_to_hbm [thread:$0]  %s1062_s29, 16, %s1671_s7, [#allocation5]  }
 0x331   :  { %1509 = dma.done.wait [#allocation5], 16  }
 0x332   :  { %1510 = vsyncadd [#allocation5], 4294967280 }
 0x333   :  { %1068 = vsyncpa [#allocation4], 1 }
 0x334   :  { %1069 = vsyncpa [#allocation7], 1 }
 0x335   :  { %1070 = vsyncpa [#allocation10], 1 }
 0x336   :  { %1071 = vsyncpa [#allocation5], 1 }

</bundles_post_ra>
